<compile_context>
chip_gen: v6e
topology: v6e:2x2x1
jax: 0.10.0
libtpu: 0.0.40
codegen_flags: <defaults>
</compile_context>

<pallas_src>
import math
import jax
import jax.numpy as jnp
from jax.experimental import pallas as pl
from jax.experimental.pallas import tpu as pltpu


# ------------------------------- kernel -------------------------------------

def _glu_kernel(a_ref, g_ref, o_ref):
    # a_ref / g_ref / o_ref: (o_blk, f_blk) VMEM tiles.
    gate = jax.nn.sigmoid(g_ref[...].astype(jnp.float32)).astype(o_ref.dtype)
    o_ref[...] = a_ref[...] * gate


# ----------------------------- tiling helpers -------------------------------

def _round_down(n, m):
    return (n // m) * m


def _round_up(n, m):
    return -(-n // m) * m


def _target_block_bytes():
    # ~2 MiB per input block keeps every generation (incl. v5e's 16 MiB default
    # scoped VMEM) on the flat part of the HBM roofline; v7x streams ~2.3x
    # faster, so use ~4 MiB there to keep the ~0.35 us/step overhead amortized.
    try:
        kind = jax.devices()[0].device_kind.lower()
    except Exception:
        kind = ""
    return (4 << 20) if "v7" in kind else (2 << 20)


def _select_blocks(outer, f, itemsize, target_bytes, sub):
    """Pick (o_blk, f_blk).  Invariants: f_blk divides f and is a multiple of
    128; o_blk is a multiple of `sub` or the full outer extent; block size is
    targeted in bytes (dtype independent)."""
    # Lane-axis block.
    if f * itemsize * sub <= target_bytes:
        f_blk = f                                    # full feature extent
    else:
        budget = max(128, _round_down(target_bytes // (sub * itemsize), 128))
        m = f // 128                                 # f % 128 == 0 by contract
        f_blk = 128
        d = 1
        while d * d <= m:                            # largest 128*divisor <= budget
            if m % d == 0:
                for cand in (d, m // d):
                    c = cand * 128
                    if f_blk < c <= budget:
                        f_blk = c
            d += 1
    # Sublane-axis block (fill the byte budget).
    rows = max(sub, _round_down(target_bytes // (f_blk * itemsize), sub))
    o_blk = outer if rows >= outer else rows
    # Megacore occupancy (v7x has 2 TensorCores): make sure a large array
    # actually splits into >= 2 grid points.
    n_fb = f // f_blk
    total_bytes = outer * 2 * f * itemsize
    if (pl.cdiv(outer, o_blk) * n_fb) < 2 and outer >= 2 * sub and total_bytes >= (1 << 20):
        o_blk = min(o_blk, _round_up(_round_up(outer, 2) // 2, sub))
    return o_blk, f_blk


# ------------------------------- wrapper ------------------------------------

def glu(x, dim=-1, *, block_o=None, block_f=None):
    """Pallas TPU GLU: split x in two along `dim`, return a * sigmoid(g)."""
    nd = x.ndim
    dim = dim % nd
    two_s = x.shape[dim]
    if two_s % 2 != 0:
        raise ValueError(f"GLU dim size must be even, got {two_s}")
    s = two_s // 2
    outer = math.prod(x.shape[:dim])              # == 1 when dim == 0
    inner = math.prod(x.shape[dim + 1:])          # == 1 when dim is last
    f = s * inner
    out_shape = x.shape[:dim] + (s,) + x.shape[dim + 1:]

    # Lane-sparse guard (perf review item): output lane width < 128 or not a
    # multiple of 128 lowers to masked vst.msk partial stores -> plain XLA.
    if outer == 0 or f == 0 or (f % 128) != 0:
        a, g = jnp.split(x, 2, axis=dim)
        return a * jax.nn.sigmoid(g)

    itemsize = jnp.dtype(x.dtype).itemsize
    sub = max(8, 32 // itemsize)                  # 8 (f32) / 16 (bf16) / 32 (int8)

    o_blk, f_blk = _select_blocks(outer, f, itemsize, _target_block_bytes(), sub)
    if block_f is not None:
        if f % block_f != 0 or block_f % 128 != 0:
            raise ValueError("block_f must divide f and be a multiple of 128")
        f_blk = block_f
    if block_o is not None:
        o_blk = min(block_o, outer)
        if o_blk < outer:
            o_blk = max(sub, _round_down(o_blk, sub))

    # Contiguous (zero-copy) 2-D view: columns [0, f) are the first chunk,
    # columns [f, 2f) are the gate.
    x2 = x.reshape(outer, 2 * f)
    n_fb = f // f_blk
    grid = (pl.cdiv(outer, o_blk), n_fb)

    def half_spec(which):
        col0 = which * n_fb
        return pl.BlockSpec((o_blk, f_blk), lambda o, ff, _c=col0: (o, _c + ff))

    block_bytes = o_blk * f_blk * itemsize
    # 2 inputs + 1 output, double-buffered, plus Mosaic internal scratch margin.
    vmem_limit = int(min(max(6 * block_bytes + (4 << 20), 16 << 20), 56 << 20))

    out2 = pl.pallas_call(
        _glu_kernel,
        out_shape=jax.ShapeDtypeStruct((outer, f), x.dtype),
        grid=grid,
        in_specs=[half_spec(0), half_spec(1)],
        out_specs=pl.BlockSpec((o_blk, f_blk), lambda o, ff: (o, ff)),
        compiler_params=pltpu.CompilerParams(
            dimension_semantics=("parallel", "parallel"),
            vmem_limit_bytes=vmem_limit),
    )(x2, x2)

    return out2.reshape(out_shape)


# ------------------------------ reference -----------------------------------

def glu_ref(x, dim=-1):
    a, g = jnp.split(x, 2, axis=dim)
    return a * jax.nn.sigmoid(g)


# --------------------------------- main -------------------------------------

if __name__ == "__main__":
    key = jax.random.PRNGKey(0)
    k1, k2, k3, k4 = jax.random.split(key, 4)

    # Case 1: feature-last layout (B, T, 2*D), lane-dense Pallas path (f = 128).
    x1 = jax.random.normal(k1, (2, 8, 256), jnp.float32)
    out1 = jax.block_until_ready(glu(x1, dim=-1))
    ref1 = glu_ref(x1, dim=-1)
    assert out1.shape == (2, 8, 128)
    err1 = float(jnp.max(jnp.abs(out1 - ref1)))
    assert err1 < 1e-5, f"case1 max abs error: {err1}"

    # Case 2: channels-first layout (B, 2*C, T), split along dim=1 — the
    # Conformer conv-module usage.  f = 64 < 128 -> lane-sparse guard path.
    x2 = jax.random.normal(k2, (2, 16, 8), jnp.float32)
    out2 = jax.block_until_ready(glu(x2, dim=1))
    ref2 = glu_ref(x2, dim=1)
    assert out2.shape == (2, 8, 8)
    err2 = float(jnp.max(jnp.abs(out2 - ref2)))
    assert err2 < 1e-5, f"case2 max abs error: {err2}"

    # Case 3: multi-block grid (4 x 2) with explicit block override — exercises
    # the column-offset index_map math for ff > 0 on both halves.
    x3 = jax.random.normal(k3, (4, 8, 512), jnp.float32)
    out3 = jax.block_until_ready(glu(x3, dim=-1, block_o=8, block_f=128))
    ref3 = glu_ref(x3, dim=-1)
    assert out3.shape == (4, 8, 256)
    err3 = float(jnp.max(jnp.abs(out3 - ref3)))
    assert err3 < 1e-5, f"case3 max abs error: {err3}"

    # Case 4: bf16 input — native-dtype multiply, f32 sigmoid, byte-sized blocks.
    x4 = jax.random.normal(k4, (2, 8, 256), jnp.float32).astype(jnp.bfloat16)
    out4 = jax.block_until_ready(glu(x4, dim=-1))
    ref4 = glu_ref(x4.astype(jnp.float32), dim=-1)
    assert out4.shape == (2, 8, 128)
    err4 = float(jnp.max(jnp.abs(out4.astype(jnp.float32) - ref4)))
    assert err4 < 5e-2, f"case4 (bf16) max abs error: {err4}"

    print("KERNEL_OK")
</pallas_src>

<mosaic_0001>
module attributes {stable_mosaic.version = 11 : i64} {
  func.func @_glu_kernel(%arg0: i32, %arg1: i32, %arg2: memref<16x128xf32, #tpu.memory_space<vmem>>, %arg3: memref<16x128xf32, #tpu.memory_space<vmem>>, %arg4: memref<16x128xf32, #tpu.memory_space<vmem>>) attributes {dimension_semantics = [#tpu.dimension_semantics<parallel>, #tpu.dimension_semantics<parallel>], iteration_bounds = array<i64: 1, 1>, scalar_prefetch = 0 : i64, scratch_operands = 0 : i64, tpu.core_type = #tpu.core_type<tc>, window_params = [{transform_indices = @transform_0, window_bounds = array<i64: 16, 128>}, {transform_indices = @transform_1, window_bounds = array<i64: 16, 128>}, {transform_indices = @transform_2, window_bounds = array<i64: 16, 128>}]} {
    %c0 = arith.constant 0 : index
    %c0_0 = arith.constant 0 : index
    %0 = vector.load %arg3[%c0, %c0_0] : memref<16x128xf32, #tpu.memory_space<vmem>>, vector<16x128xf32>
    %1 = arith.negf %0 : vector<16x128xf32>
    %2 = math.exp %1 : vector<16x128xf32>
    %cst = arith.constant 1.000000e+00 : f32
    %3 = vector.broadcast %cst : f32 to vector<16x128xf32>
    %4 = arith.addf %3, %2 : vector<16x128xf32>
    %5 = arith.divf %3, %4 : vector<16x128xf32>
    %c0_1 = arith.constant 0 : index
    %c0_2 = arith.constant 0 : index
    %6 = vector.load %arg2[%c0_1, %c0_2] : memref<16x128xf32, #tpu.memory_space<vmem>>, vector<16x128xf32>
    %7 = arith.mulf %6, %5 : vector<16x128xf32>
    %c0_3 = arith.constant 0 : index
    %c0_4 = arith.constant 0 : index
    %8 = vector.load %arg4[%c0_3, %c0_4] : memref<16x128xf32, #tpu.memory_space<vmem>>, vector<16x128xf32>
    tpu.vector_store %arg4[%c0_3, %c0_4], %7 {strides = array<i32>} : memref<16x128xf32, #tpu.memory_space<vmem>>, vector<16x128xf32>,
    return
  }
  func.func @transform_0(%arg0: i32, %arg1: i32) -> (i32, i32) {
    %c0_i32 = arith.constant 0 : i32
    %0 = arith.addi %c0_i32, %arg1 : i32
    %c0_i32_0 = arith.constant 0 : i32
    return %arg0, %0 : i32, i32
  }
  func.func @transform_1(%arg0: i32, %arg1: i32) -> (i32, i32) {
    %c1_i32 = arith.constant 1 : i32
    %0 = arith.addi %c1_i32, %arg1 : i32
    %c0_i32 = arith.constant 0 : i32
    return %arg0, %0 : i32, i32
  }
  func.func @transform_2(%arg0: i32, %arg1: i32) -> (i32, i32) {
    %c0_i32 = arith.constant 0 : i32
    return %arg0, %arg1 : i32, i32
  }
}

</mosaic_0001>

<bundles_post_ra>
// kernel: tpu_custom_call.1
= control target key start
LH: loop header
LB: loop body
LE: loop exit
PB: predicated region body
PF: predicated region fallthrough
CT: control target
= control target key end

     0   :  { %7 = vsyncpa [#allocation3], 0  ;;  %s205_s0 = inlined_call_operand.hbm [shape: f32[16,256], index: 0, kind: input, shape index: {}]   ;;  %s206_s1 = inlined_call_operand.hbm [shape: f32[16,256], index: 1, kind: input, shape index: {}]   ;;  %s207_s2 = inlined_call_operand.hbm [shape: f32[16,128], index: 2, kind: output, shape index: {}]  }
   0x1   :  { %8 = vsyncpa [#allocation6], 0 }
   0x2   :  { %9 = vsyncpa [#allocation4], 0  ;;  %s168_s9 = smov [#allocation2]  }
   0x3   :  { %s15_s10 = sshll.u32 %s168_s9, 4  ;;  %s16_s10 = int_to_ptr.vmem [resolvable:$true] %s15_s10 }
   0x4   :  { %s107_s11 = scalar_lea.vmem %s16_s10, 256  ;;  %p112_p1 = scmp.lt.s32.totalorder %s16_s10, %s16_s10 }
   0x5   :  { %p108_p0 = scmp.ne.s32.totalorder %s16_s10, %s107_s11  ;;  %p113_p2 = scmp.lt.s32.totalorder %s107_s11, %s107_s11 }
   0x7   :  { %p114_p3 = por %p113_p2, %p112_p1 }
   0x9   :  { %p115_p4 = pnand %p114_p3, %p108_p0 }
   0xb   :  { %118 = shalt.err (!%p115_p4)
}
   0xc   :  { %s169_s12 = smov 256   ;;  %s170_s13 = smov 128  }
   0xd   :  { %s171_s14 = smov 8   ;;  %s82_s19 = scalar_lea.hbm %s206_s1, 128 }
   0xe   :  { %21 = dma.hbm_to_vmem [thread:$0]  %s205_s0, 256, %s16_s10, [#allocation3], %s169_s12, %s170_s13, %s171_s14  }
   0xf   :  { %s172_s20 = smov [#allocation5]  }
  0x10   :  { %s30_s21 = sshll.u32 %s172_s20, 4  ;;  %s31_s21 = int_to_ptr.vmem [resolvable:$true] %s30_s21 }
  0x11   :  { %s129_s22 = scalar_lea.vmem %s31_s21, 256  ;;  %p134_p6 = scmp.lt.s32.totalorder %s31_s21, %s31_s21 }
  0x12   :  { %p130_p5 = scmp.ne.s32.totalorder %s31_s21, %s129_s22  ;;  %p135_p7 = scmp.lt.s32.totalorder %s129_s22, %s129_s22 }
  0x14   :  { %p136_p8 = por %p135_p7, %p134_p6 }
  0x16   :  { %p137_p9 = pnand %p136_p8, %p130_p5 }
  0x18   :  { %140 = shalt.err (!%p137_p9)
}
  0x19   :  { %36 = dma.hbm_to_vmem [thread:$0]  %s82_s19, 256, %s31_s21, [#allocation6], %s169_s12, %s170_s13, %s171_s14  }
  0x1a   :  { %162 = dma.done.wait [#allocation3], 256  }
  0x1b   :  { %163 = vsyncadd [#allocation3], 4294967040 }
  0x1c   :  { %164 = dma.done.wait [#allocation6], 256  }
  0x1d   :  { %165 = vsyncadd [#allocation6], 4294967040  ;;  %v44_v0 = vld [vmem:[#allocation5] sm:$0xff]  ;;  %v45_v1 = vld [vmem:[#allocation5 + $0x8] sm:$0xff]  ;;  %s173_s0 = smov [#allocation7]  }
  0x1e   :  { %v83_v2 = vmul.f32 -1.442695, %v44_v0  ;;  %v84_v3 = vmul.f32 -1.442695, %v45_v1  ;;  %v58_v8 = vld [vmem:[#allocation2] sm:$0xff]  ;;  %v59_v9 = vld [vmem:[#allocation2 + $0x8] sm:$0xff] }
  0x1f   :  { %s69_s1 = sshll.u32 %s173_s0, 4  ;;  %s70_s1 = int_to_ptr.vmem [resolvable:$true] %s69_s1 }
  0x20   :  { %91 = vpow2.f32 %v83_v2  ;;  %s142_s23 = scalar_lea.vmem %s70_s1, 256  ;;  %p147_p11 = scmp.lt.s32.totalorder %s70_s1, %s70_s1 }
  0x21   :  { %93 = vpow2.f32 %v84_v3  ;;  %p143_p10 = scmp.ne.s32.totalorder %s70_s1, %s142_s23  ;;  %p148_p12 = scmp.lt.s32.totalorder %s142_s23, %s142_s23 }
  0x23   :  { %p149_p13 = por %p148_p12, %p147_p11 }
  0x25   :  { %p150_p0 = pnand %p149_p13, %p143_p10 }
  0x2d   :  { %v92_v4 = vpop.eup %91 }
  0x2e   :  { %v94_v5 = vpop.eup %93  ;;  %v52_v6 = vadd.f32 1.0, %v92_v4 }
  0x2f   :  { %v53_v7 = vadd.f32 1.0, %v94_v5 }
  0x30   :  { %95 = vrcp.f32 %v52_v6 }
  0x31   :  { %97 = vrcp.f32 %v53_v7 }
  0x3d   :  { %v96_v10 = vpop.eup %95 }
  0x3e   :  { %v98_v11 = vpop.eup %97  ;;  %v60_v12 = vmul.f32 %v96_v10, %v58_v8 }
  0x3f   :  { %v61_v13 = vmul.f32 %v98_v11, %v59_v9 }
  0x40   :  { %62 = vst [vmem:[#allocation7] sm:$0xff] %v60_v12 }
  0x41   :  { %63 = vst [vmem:[#allocation7 + $0x8] sm:$0xff] %v61_v13 }
  0x42   :  { %153 = shalt.err (!%p150_p0)
}
  0x43   :  { %75 = dma.vmem_to_hbm [thread:$0]  %s70_s1, 256, %s207_s2, [#allocation4], %s170_s13, %s170_s13, %s171_s14  }
  0x44   :  { %166 = dma.done.wait [#allocation4], 256  }
  0x45   :  { %167 = vsyncadd [#allocation4], 4294967040 }
  0x46   :  { %79 = vsyncpa [#allocation3], 1 }
  0x47   :  { %80 = vsyncpa [#allocation6], 1 }
  0x48   :  { %81 = vsyncpa [#allocation4], 1 }

</bundles_post_ra>
